<compile_context>
chip_gen: v7x
topology: tpu7x:2x2x1
jax: 0.10.0
libtpu: 0.0.40
codegen_flags: <defaults>
</compile_context>

<pallas_src>
import functools

import jax
import jax.numpy as jnp
from jax.experimental import pallas as pl
from jax.experimental.pallas import tpu as pltpu


def _pack_layout(hidden, fpad=8):
    """Row offsets of the packed weight array (all blocks 8-row aligned)."""
    sw = 4 * hidden
    wx_r = 0
    wh_r = fpad
    bb_r = wh_r + sw
    bf_r = bb_r + 1
    wf_r = ((bf_r + 1 + 7) // 8) * 8
    rows = wf_r + sw
    return dict(wx_r=wx_r, wh_r=wh_r, bb_r=bb_r, bf_r=bf_r, wf_r=wf_r, rows=rows)


def regression_lstm_kernel(x2dp_ref, wpack_ref, out_ref, *,
                           seq_len, bp, hidden, fpad, out_w,
                           wx_r, wh_r, bb_r, bf_r, wf_r):
    H = hidden
    H2 = 2 * H          # packed (layer-0 | layer-1) state width
    SW = 4 * H          # lane width of the h/c state (lanes >= 2H are don't-care)
    GW = 8 * H          # fused gate width
    T = seq_len

    Wx = wpack_ref[wx_r:wx_r + fpad, :]            # (fpad, GW) layer-0 input proj
    Wh = wpack_ref[wh_r:wh_r + SW, :]              # (SW, GW)   fused recurrent weight
    bb = wpack_ref[bb_r:bb_r + 1, :]               # (1, GW)    fused gate bias
    Wf = wpack_ref[wf_r:wf_r + SW, 0:out_w]        # (SW, out_w) folded fc@fc1@fc2
    bf = wpack_ref[bf_r:bf_r + 1, 0:out_w]         # (1, out_w)

    # Base gate pre-activations for all skewed iterations in one MXU op
    # (layer-0 input projection + both layers' biases, g-cols pre-scaled x2).
    base = jnp.dot(x2dp_ref[...], Wx, preferred_element_type=jnp.float32) + bb

    # Packed state: lanes [0,H) = layer-0, [H,2H) = layer-1, [2H,SW) don't-care.
    h = jnp.zeros((bp, SW), jnp.float32)
    c = jnp.zeros((bp, SW), jnp.float32)
    lane = jax.lax.broadcasted_iota(jnp.int32, (bp, SW), 1)
    l0_mask = (lane < H).astype(jnp.float32)       # used only at s == 0

    # Skewed time loop: iteration s runs layer-0 step s and layer-1 step s-1.
    for s in range(T + 1):
        g = base[s * bp:(s + 1) * bp, :]
        if s > 0:
            # One fused MXU op: [h0_{s-1} | h1_{s-2} | .] @ [whh0|wih1 ; 0|whh1 ; 0].
            g = g + jnp.dot(h, Wh, preferred_element_type=jnp.float32)
        sg = jax.nn.sigmoid(g)                     # single EUP pass over (bp, GW)
        v0 = sg[:, 0:SW]                           # [ i        | sigmoid(2g) ]
        v1 = sg[:, SW:GW]                          # [ f        | o           ]
        tg = 2.0 * pltpu.roll(v0, shift=H2, axis=1) - 1.0      # [ tanh(g) | . ]
        c = v0 * tg + v1 * c                       # [ i*tanh(g) + f*c | . ]
        h = pltpu.roll(v1, shift=H2, axis=1) * jnp.tanh(c)      # [ o*tanh(c) | . ]
        if s == 0:
            # Layer 1 must stay at its zero initial state until it has seen h0_0.
            c = c * l0_mask
            h = h * l0_mask

    # h lanes [H, 2H) == h1 at the last timestep == lstm output[:, -1, :].
    # Wf rows outside [H, 2H) are zero, so no state slice is needed for the head.
    out = jnp.maximum(h, 0.0)                      # ReLU
    out = jnp.dot(out, Wf, preferred_element_type=jnp.float32) + bf
    out_ref[...] = out.astype(out_ref.dtype)


def prepare_params(params, *, num_features, hidden, t_out, fpad=8, out_w=128):
    """One-time weight preparation (hoisted out of the per-call hot path)."""
    H = hidden
    F = num_features
    GW = 8 * H
    lay = _pack_layout(H, fpad)

    def place(dst, src4h, layer, r0):
        # src4h: (R, 4H), PyTorch gate order [i | f | g | o] along columns.
        # Kernel gate layout: [i0 i1 | g0 g1 | f0 f1 | o0 o1] (each block H wide);
        # g columns pre-scaled by 2 so that tanh(g) == 2*sigmoid(2g) - 1.
        R = src4h.shape[0]
        i, f, g, o = (src4h[:, k * H:(k + 1) * H] for k in range(4))
        for grp, blk in ((0, i), (1, 2.0 * g), (2, f), (3, o)):
            col = grp * 2 * H + layer * H
            dst = dst.at[r0:r0 + R, col:col + H].set(blk)
        return dst

    wpack = jnp.zeros((lay["rows"], GW), jnp.float32)

    # Base projection: only layer-0 sees the input x.
    wpack = place(wpack, params["wih0"].T, layer=0, r0=lay["wx_r"])
    # Fused recurrent weight: rows [0,H) multiply h0_{s-1}; rows [H,2H) multiply
    # h1_{s-2}; rows [2H,4H) (don't-care lanes of the packed state) stay zero.
    wpack = place(wpack, params["whh0"].T, layer=0, r0=lay["wh_r"])
    wpack = place(wpack, params["wih1"].T, layer=1, r0=lay["wh_r"])
    wpack = place(wpack, params["whh1"].T, layer=1, r0=lay["wh_r"] + H)
    # Combined biases (b_ih + b_hh) for both layers, folded into the base gates.
    wpack = place(wpack, (params["bih0"] + params["bhh0"])[None, :], 0, lay["bb_r"])
    wpack = place(wpack, (params["bih1"] + params["bhh1"])[None, :], 1, lay["bb_r"])

    # Fold the activation-free fc -> fc1 -> fc2 head into one weight/bias, padded
    # so the kernel output store is a full 128-lane granule.
    A, Bm, C = params["wfc"].T, params["wfc1"].T, params["wfc2"].T
    wf = A @ Bm @ C                                                   # (H, t_out)
    bf = ((params["bfc"][None, :] @ Bm + params["bfc1"][None, :]) @ C
          + params["bfc2"][None, :])                                  # (1, t_out)
    wpack = wpack.at[lay["wf_r"] + H:lay["wf_r"] + 2 * H, 0:t_out].set(wf)
    wpack = wpack.at[lay["bf_r"]:lay["bf_r"] + 1, 0:t_out].set(bf)
    # TODO(synk): on v6e/v7x a bf16 cast of the recurrent block would halve weight
    # footprint; kept f32 so the 1e-4 reference tolerance holds unconditionally.
    return wpack


@functools.partial(jax.jit, static_argnames=("hidden", "t_out"))
def regression_lstm_forward(x, wpack, *, hidden, t_out):
    """Per-call path: tiny input reshuffle + one pallas_call, jitted as one dispatch."""
    B, T, F = x.shape
    BP = max(8, -(-B // 8) * 8)      # pad batch to full 8-sublane granules
    FPAD = 8
    OUT_W = 128
    lay = _pack_layout(hidden, FPAD)

    # Time-major, batch/feature zero-padded input, with one extra zero time block
    # for the skewed final iteration (layer-1 step T-1).
    xt = jnp.transpose(x, (1, 0, 2)).astype(jnp.float32)             # (T, B, F)
    xt = jnp.pad(xt, ((0, 1), (0, BP - B), (0, FPAD - F)))
    x2dp = xt.reshape((T + 1) * BP, FPAD)

    kernel = functools.partial(
        regression_lstm_kernel, seq_len=T, bp=BP, hidden=hidden, fpad=FPAD,
        out_w=OUT_W, wx_r=lay["wx_r"], wh_r=lay["wh_r"], bb_r=lay["bb_r"],
        bf_r=lay["bf_r"], wf_r=lay["wf_r"])
    vmem = pl.BlockSpec(memory_space=pltpu.MemorySpace.VMEM)
    # NOTE: whole-problem-in-VMEM (a few hundred KB).  If batch/seq ever scale,
    # add a batch grid axis with dimension_semantics=("parallel",) (also feeds
    # v7x's second TensorCore) and re-derive sizes against the 64 MiB v7x VMEM.
    out = pl.pallas_call(
        kernel,
        out_shape=jax.ShapeDtypeStruct((BP, OUT_W), jnp.float32),
        in_specs=[vmem, vmem],
        out_specs=vmem,
    )(x2dp, wpack)
    return out[:B, :t_out]


def init_params(key, num_features, hidden, lin_layers, t_out):
    """Deterministic init mimicking PyTorch's uniform(-1/sqrt(fan), 1/sqrt(fan))."""
    ks = jax.random.split(key, 14)

    def u(k, shape, bound):
        return jax.random.uniform(k, shape, jnp.float32, -bound, bound)

    kh = 1.0 / float(hidden) ** 0.5
    kl = 1.0 / float(lin_layers) ** 0.5
    return {
        "wih0": u(ks[0], (4 * hidden, num_features), kh),
        "whh0": u(ks[1], (4 * hidden, hidden), kh),
        "bih0": u(ks[2], (4 * hidden,), kh),
        "bhh0": u(ks[3], (4 * hidden,), kh),
        "wih1": u(ks[4], (4 * hidden, hidden), kh),
        "whh1": u(ks[5], (4 * hidden, hidden), kh),
        "bih1": u(ks[6], (4 * hidden,), kh),
        "bhh1": u(ks[7], (4 * hidden,), kh),
        "wfc": u(ks[8], (lin_layers, hidden), kh),
        "bfc": u(ks[9], (lin_layers,), kh),
        "wfc1": u(ks[10], (lin_layers, lin_layers), kl),
        "bfc1": u(ks[11], (lin_layers,), kl),
        "wfc2": u(ks[12], (t_out, lin_layers), kl),
        "bfc2": u(ks[13], (t_out,), kl),
    }


def reference_forward(x, params, *, hidden, t_out):
    """Pure-JAX reference with PyTorch-identical semantics, for correctness check."""
    B, T, F = x.shape
    H = hidden

    def cell(x_t, h, c, wih, whh, bih, bhh):
        g = x_t @ wih.T + bih + h @ whh.T + bhh
        i = jax.nn.sigmoid(g[:, 0:H])
        f = jax.nn.sigmoid(g[:, H:2 * H])
        gg = jnp.tanh(g[:, 2 * H:3 * H])
        o = jax.nn.sigmoid(g[:, 3 * H:4 * H])
        c = f * c + i * gg
        h = o * jnp.tanh(c)
        return h, c

    h0 = c0 = h1 = c1 = jnp.zeros((B, H), jnp.float32)
    for t in range(T):
        h0, c0 = cell(x[:, t, :], h0, c0, params["wih0"], params["whh0"],
                      params["bih0"], params["bhh0"])
        h1, c1 = cell(h0, h1, c1, params["wih1"], params["whh1"],
                      params["bih1"], params["bhh1"])
    out = jnp.maximum(h1, 0.0)
    out = out @ params["wfc"].T + params["bfc"]
    out = out @ params["wfc1"].T + params["bfc1"]
    out = out @ params["wfc2"].T + params["bfc2"]
    return out


if __name__ == "__main__":
    # Small shapes implied by the module: batch=2, seq=8, num_features=4,
    # num_hidden_units=32, num_layers=2, lin_layers=32, t=4.
    B, T, F = 2, 8, 4
    HIDDEN, LIN, T_OUT = 32, 32, 4

    key = jax.random.PRNGKey(0)
    kx, kp = jax.random.split(key)
    x = jax.random.normal(kx, (B, T, F), jnp.float32)
    params = init_params(kp, F, HIDDEN, LIN, T_OUT)

    # One-time weight preparation (hoisted out of the per-call hot path).
    wpack = jax.block_until_ready(
        prepare_params(params, num_features=F, hidden=HIDDEN, t_out=T_OUT))

    out = regression_lstm_forward(x, wpack, hidden=HIDDEN, t_out=T_OUT)
    out = jax.block_until_ready(out)

    ref = reference_forward(x, params, hidden=HIDDEN, t_out=T_OUT)
    assert out.shape == (B, T_OUT)
    assert jnp.allclose(out, ref, atol=1e-4, rtol=1e-4), (out, ref)

    print("KERNEL_OK")
</pallas_src>

<mosaic_0001>
module attributes {stable_mosaic.version = 11 : i64} {
  func.func @regression_lstm_kernel(%arg0: memref<72x8xf32, #tpu.memory_space<vmem>>, %arg1: memref<272x256xf32, #tpu.memory_space<vmem>>, %arg2: memref<8x128xf32, #tpu.memory_space<vmem>>) attributes {dimension_semantics = [], scalar_prefetch = 0 : i64, scratch_operands = 0 : i64, tpu.core_type = #tpu.core_type<tc>} {
    %c0 = arith.constant 0 : index
    %c0_0 = arith.constant 0 : index
    %0 = vector.load %arg1[%c0, %c0_0] : memref<272x256xf32, #tpu.memory_space<vmem>>, vector<8x256xf32>
    %c8 = arith.constant 8 : index
    %c0_1 = arith.constant 0 : index
    %1 = vector.load %arg1[%c8, %c0_1] : memref<272x256xf32, #tpu.memory_space<vmem>>, vector<128x256xf32>
    %c136 = arith.constant 136 : index
    %c0_2 = arith.constant 0 : index
    %2 = vector.load %arg1[%c136, %c0_2] : memref<272x256xf32, #tpu.memory_space<vmem>>, vector<1x256xf32>
    %c144 = arith.constant 144 : index
    %c0_3 = arith.constant 0 : index
    %3 = vector.load %arg1[%c144, %c0_3] : memref<272x256xf32, #tpu.memory_space<vmem>>, vector<128x128xf32>
    %c137 = arith.constant 137 : index
    %c0_4 = arith.constant 0 : index
    %4 = vector.load %arg1[%c137, %c0_4] : memref<272x256xf32, #tpu.memory_space<vmem>>, vector<1x128xf32>
    %c0_5 = arith.constant 0 : index
    %c0_6 = arith.constant 0 : index
    %5 = vector.load %arg0[%c0_5, %c0_6] : memref<72x8xf32, #tpu.memory_space<vmem>>, vector<72x8xf32>
    %cst = arith.constant dense<0.000000e+00> : vector<72x256xf32>
    %6 = tpu.matmul %5, %0, %cst {dimension_numbers = #tpu.dot_dimension_numbers<[1], [0], [0], [1], [0, 0, 1, 1], [], []>} : vector<72x8xf32>, vector<8x256xf32>, vector<72x256xf32> -> vector<72x256xf32>
    %7 = vector.broadcast %2 : vector<1x256xf32> to vector<72x256xf32>
    %8 = arith.addf %6, %7 : vector<72x256xf32>
    %cst_7 = arith.constant 0.000000e+00 : f32
    %9 = vector.broadcast %cst_7 : f32 to vector<8x128xf32>
    %10 = tpu.iota {dimensions = array<i32: 1>} : vector<8x128xi32>
    %c32_i32 = arith.constant 32 : i32
    %11 = vector.broadcast %c32_i32 : i32 to vector<8x128xi32>
    %12 = arith.cmpi slt, %10, %11 : vector<8x128xi32>
    %13 = arith.extui %12 : vector<8x128xi1> to vector<8x128xi32>
    %14 = arith.sitofp %13 : vector<8x128xi32> to vector<8x128xf32>
    %15 = vector.extract_strided_slice %8 {offsets = [0, 0], sizes = [8, 256], strides = [1, 1]} : vector<72x256xf32> to vector<8x256xf32>
    %16 = arith.negf %15 : vector<8x256xf32>
    %17 = math.exp %16 : vector<8x256xf32>
    %cst_8 = arith.constant 1.000000e+00 : f32
    %18 = vector.broadcast %cst_8 : f32 to vector<8x256xf32>
    %19 = arith.addf %18, %17 : vector<8x256xf32>
    %20 = arith.divf %18, %19 : vector<8x256xf32>
    %21 = vector.extract_strided_slice %20 {offsets = [0, 0], sizes = [8, 128], strides = [1, 1]} : vector<8x256xf32> to vector<8x128xf32>
    %22 = vector.extract_strided_slice %20 {offsets = [0, 128], sizes = [8, 128], strides = [1, 1]} : vector<8x256xf32> to vector<8x128xf32>
    %c64_i32 = arith.constant 64 : i32
    %23 = tpu.dynamic_rotate %21 by %c64_i32 dim 1 : vector<8x128xf32>, i32 -> vector<8x128xf32>
    %cst_9 = arith.constant 2.000000e+00 : f32
    %24 = vector.broadcast %cst_9 : f32 to vector<8x128xf32>
    %25 = arith.mulf %24, %23 : vector<8x128xf32>
    %cst_10 = arith.constant 1.000000e+00 : f32
    %26 = vector.broadcast %cst_10 : f32 to vector<8x128xf32>
    %27 = arith.subf %25, %26 : vector<8x128xf32>
    %28 = arith.mulf %21, %27 : vector<8x128xf32>
    %29 = arith.mulf %22, %9 : vector<8x128xf32>
    %30 = arith.addf %28, %29 : vector<8x128xf32>
    %c64_i32_11 = arith.constant 64 : i32
    %31 = tpu.dynamic_rotate %22 by %c64_i32_11 dim 1 : vector<8x128xf32>, i32 -> vector<8x128xf32>
    %32 = math.tanh %30 : vector<8x128xf32>
    %33 = arith.mulf %31, %32 : vector<8x128xf32>
    %34 = arith.mulf %30, %14 : vector<8x128xf32>
    %35 = arith.mulf %33, %14 : vector<8x128xf32>
    %36 = vector.extract_strided_slice %8 {offsets = [8, 0], sizes = [8, 256], strides = [1, 1]} : vector<72x256xf32> to vector<8x256xf32>
    %cst_12 = arith.constant dense<0.000000e+00> : vector<8x256xf32>
    %37 = tpu.matmul %35, %1, %cst_12 {dimension_numbers = #tpu.dot_dimension_numbers<[1], [0], [0], [1], [0, 0, 1, 1], [], []>} : vector<8x128xf32>, vector<128x256xf32>, vector<8x256xf32> -> vector<8x256xf32>
    %38 = arith.addf %36, %37 : vector<8x256xf32>
    %39 = arith.negf %38 : vector<8x256xf32>
    %40 = math.exp %39 : vector<8x256xf32>
    %cst_13 = arith.constant 1.000000e+00 : f32
    %41 = vector.broadcast %cst_13 : f32 to vector<8x256xf32>
    %42 = arith.addf %41, %40 : vector<8x256xf32>
    %43 = arith.divf %41, %42 : vector<8x256xf32>
    %44 = vector.extract_strided_slice %43 {offsets = [0, 0], sizes = [8, 128], strides = [1, 1]} : vector<8x256xf32> to vector<8x128xf32>
    %45 = vector.extract_strided_slice %43 {offsets = [0, 128], sizes = [8, 128], strides = [1, 1]} : vector<8x256xf32> to vector<8x128xf32>
    %c64_i32_14 = arith.constant 64 : i32
    %46 = tpu.dynamic_rotate %44 by %c64_i32_14 dim 1 : vector<8x128xf32>, i32 -> vector<8x128xf32>
    %cst_15 = arith.constant 2.000000e+00 : f32
    %47 = vector.broadcast %cst_15 : f32 to vector<8x128xf32>
    %48 = arith.mulf %47, %46 : vector<8x128xf32>
    %cst_16 = arith.constant 1.000000e+00 : f32
    %49 = vector.broadcast %cst_16 : f32 to vector<8x128xf32>
    %50 = arith.subf %48, %49 : vector<8x128xf32>
    %51 = arith.mulf %44, %50 : vector<8x128xf32>
    %52 = arith.mulf %45, %34 : vector<8x128xf32>
    %53 = arith.addf %51, %52 : vector<8x128xf32>
    %c64_i32_17 = arith.constant 64 : i32
    %54 = tpu.dynamic_rotate %45 by %c64_i32_17 dim 1 : vector<8x128xf32>, i32 -> vector<8x128xf32>
    %55 = math.tanh %53 : vector<8x128xf32>
    %56 = arith.mulf %54, %55 : vector<8x128xf32>
    %57 = vector.extract_strided_slice %8 {offsets = [16, 0], sizes = [8, 256], strides = [1, 1]} : vector<72x256xf32> to vector<8x256xf32>
    %cst_18 = arith.constant dense<0.000000e+00> : vector<8x256xf32>
    %58 = tpu.matmul %56, %1, %cst_18 {dimension_numbers = #tpu.dot_dimension_numbers<[1], [0], [0], [1], [0, 0, 1, 1], [], []>} : vector<8x128xf32>, vector<128x256xf32>, vector<8x256xf32> -> vector<8x256xf32>
    %59 = arith.addf %57, %58 : vector<8x256xf32>
    %60 = arith.negf %59 : vector<8x256xf32>
    %61 = math.exp %60 : vector<8x256xf32>
    %cst_19 = arith.constant 1.000000e+00 : f32
    %62 = vector.broadcast %cst_19 : f32 to vector<8x256xf32>
    %63 = arith.addf %62, %61 : vector<8x256xf32>
    %64 = arith.divf %62, %63 : vector<8x256xf32>
    %65 = vector.extract_strided_slice %64 {offsets = [0, 0], sizes = [8, 128], strides = [1, 1]} : vector<8x256xf32> to vector<8x128xf32>
    %66 = vector.extract_strided_slice %64 {offsets = [0, 128], sizes = [8, 128], strides = [1, 1]} : vector<8x256xf32> to vector<8x128xf32>
    %c64_i32_20 = arith.constant 64 : i32
    %67 = tpu.dynamic_rotate %65 by %c64_i32_20 dim 1 : vector<8x128xf32>, i32 -> vector<8x128xf32>
    %cst_21 = arith.constant 2.000000e+00 : f32
    %68 = vector.broadcast %cst_21 : f32 to vector<8x128xf32>
    %69 = arith.mulf %68, %67 : vector<8x128xf32>
    %cst_22 = arith.constant 1.000000e+00 : f32
    %70 = vector.broadcast %cst_22 : f32 to vector<8x128xf32>
    %71 = arith.subf %69, %70 : vector<8x128xf32>
    %72 = arith.mulf %65, %71 : vector<8x128xf32>
    %73 = arith.mulf %66, %53 : vector<8x128xf32>
    %74 = arith.addf %72, %73 : vector<8x128xf32>
    %c64_i32_23 = arith.constant 64 : i32
    %75 = tpu.dynamic_rotate %66 by %c64_i32_23 dim 1 : vector<8x128xf32>, i32 -> vector<8x128xf32>
    %76 = math.tanh %74 : vector<8x128xf32>
    %77 = arith.mulf %75, %76 : vector<8x128xf32>
    %78 = vector.extract_strided_slice %8 {offsets = [24, 0], sizes = [8, 256], strides = [1, 1]} : vector<72x256xf32> to vector<8x256xf32>
    %cst_24 = arith.constant dense<0.000000e+00> : vector<8x256xf32>
    %79 = tpu.matmul %77, %1, %cst_24 {dimension_numbers = #tpu.dot_dimension_numbers<[1], [0], [0], [1], [0, 0, 1, 1], [], []>} : vector<8x128xf32>, vector<128x256xf32>, vector<8x256xf32> -> vector<8x256xf32>
    %80 = arith.addf %78, %79 : vector<8x256xf32>
    %81 = arith.negf %80 : vector<8x256xf32>
    %82 = math.exp %81 : vector<8x256xf32>
    %cst_25 = arith.constant 1.000000e+00 : f32
    %83 = vector.broadcast %cst_25 : f32 to vector<8x256xf32>
    %84 = arith.addf %83, %82 : vector<8x256xf32>
    %85 = arith.divf %83, %84 : vector<8x256xf32>
    %86 = vector.extract_strided_slice %85 {offsets = [0, 0], sizes = [8, 128], strides = [1, 1]} : vector<8x256xf32> to vector<8x128xf32>
    %87 = vector.extract_strided_slice %85 {offsets = [0, 128], sizes = [8, 128], strides = [1, 1]} : vector<8x256xf32> to vector<8x128xf32>
    %c64_i32_26 = arith.constant 64 : i32
    %88 = tpu.dynamic_rotate %86 by %c64_i32_26 dim 1 : vector<8x128xf32>, i32 -> vector<8x128xf32>
    %cst_27 = arith.constant 2.000000e+00 : f32
    %89 = vector.broadcast %cst_27 : f32 to vector<8x128xf32>
    %90 = arith.mulf %89, %88 : vector<8x128xf32>
    %cst_28 = arith.constant 1.000000e+00 : f32
    %91 = vector.broadcast %cst_28 : f32 to vector<8x128xf32>
    %92 = arith.subf %90, %91 : vector<8x128xf32>
    %93 = arith.mulf %86, %92 : vector<8x128xf32>
    %94 = arith.mulf %87, %74 : vector<8x128xf32>
    %95 = arith.addf %93, %94 : vector<8x128xf32>
    %c64_i32_29 = arith.constant 64 : i32
    %96 = tpu.dynamic_rotate %87 by %c64_i32_29 dim 1 : vector<8x128xf32>, i32 -> vector<8x128xf32>
    %97 = math.tanh %95 : vector<8x128xf32>
    %98 = arith.mulf %96, %97 : vector<8x128xf32>
    %99 = vector.extract_strided_slice %8 {offsets = [32, 0], sizes = [8, 256], strides = [1, 1]} : vector<72x256xf32> to vector<8x256xf32>
    %cst_30 = arith.constant dense<0.000000e+00> : vector<8x256xf32>
    %100 = tpu.matmul %98, %1, %cst_30 {dimension_numbers = #tpu.dot_dimension_numbers<[1], [0], [0], [1], [0, 0, 1, 1], [], []>} : vector<8x128xf32>, vector<128x256xf32>, vector<8x256xf32> -> vector<8x256xf32>
    %101 = arith.addf %99, %100 : vector<8x256xf32>
    %102 = arith.negf %101 : vector<8x256xf32>
    %103 = math.exp %102 : vector<8x256xf32>
    %cst_31 = arith.constant 1.000000e+00 : f32
    %104 = vector.broadcast %cst_31 : f32 to vector<8x256xf32>
    %105 = arith.addf %104, %103 : vector<8x256xf32>
    %106 = arith.divf %104, %105 : vector<8x256xf32>
    %107 = vector.extract_strided_slice %106 {offsets = [0, 0], sizes = [8, 128], strides = [1, 1]} : vector<8x256xf32> to vector<8x128xf32>
    %108 = vector.extract_strided_slice %106 {offsets = [0, 128], sizes = [8, 128], strides = [1, 1]} : vector<8x256xf32> to vector<8x128xf32>
    %c64_i32_32 = arith.constant 64 : i32
    %109 = tpu.dynamic_rotate %107 by %c64_i32_32 dim 1 : vector<8x128xf32>, i32 -> vector<8x128xf32>
    %cst_33 = arith.constant 2.000000e+00 : f32
    %110 = vector.broadcast %cst_33 : f32 to vector<8x128xf32>
    %111 = arith.mulf %110, %109 : vector<8x128xf32>
    %cst_34 = arith.constant 1.000000e+00 : f32
    %112 = vector.broadcast %cst_34 : f32 to vector<8x128xf32>
    %113 = arith.subf %111, %112 : vector<8x128xf32>
    %114 = arith.mulf %107, %113 : vector<8x128xf32>
    %115 = arith.mulf %108, %95 : vector<8x128xf32>
    %116 = arith.addf %114, %115 : vector<8x128xf32>
    %c64_i32_35 = arith.constant 64 : i32
    %117 = tpu.dynamic_rotate %108 by %c64_i32_35 dim 1 : vector<8x128xf32>, i32 -> vector<8x128xf32>
    %118 = math.tanh %116 : vector<8x128xf32>
    %119 = arith.mulf %117, %118 : vector<8x128xf32>
    %120 = vector.extract_strided_slice %8 {offsets = [40, 0], sizes = [8, 256], strides = [1, 1]} : vector<72x256xf32> to vector<8x256xf32>
    %cst_36 = arith.constant dense<0.000000e+00> : vector<8x256xf32>
    %121 = tpu.matmul %119, %1, %cst_36 {dimension_numbers = #tpu.dot_dimension_numbers<[1], [0], [0], [1], [0, 0, 1, 1], [], []>} : vector<8x128xf32>, vector<128x256xf32>, vector<8x256xf32> -> vector<8x256xf32>
    %122 = arith.addf %120, %121 : vector<8x256xf32>
    %123 = arith.negf %122 : vector<8x256xf32>
    %124 = math.exp %123 : vector<8x256xf32>
    %cst_37 = arith.constant 1.000000e+00 : f32
    %125 = vector.broadcast %cst_37 : f32 to vector<8x256xf32>
    %126 = arith.addf %125, %124 : vector<8x256xf32>
    %127 = arith.divf %125, %126 : vector<8x256xf32>
    %128 = vector.extract_strided_slice %127 {offsets = [0, 0], sizes = [8, 128], strides = [1, 1]} : vector<8x256xf32> to vector<8x128xf32>
    %129 = vector.extract_strided_slice %127 {offsets = [0, 128], sizes = [8, 128], strides = [1, 1]} : vector<8x256xf32> to vector<8x128xf32>
    %c64_i32_38 = arith.constant 64 : i32
    %130 = tpu.dynamic_rotate %128 by %c64_i32_38 dim 1 : vector<8x128xf32>, i32 -> vector<8x128xf32>
    %cst_39 = arith.constant 2.000000e+00 : f32
    %131 = vector.broadcast %cst_39 : f32 to vector<8x128xf32>
    %132 = arith.mulf %131, %130 : vector<8x128xf32>
    %cst_40 = arith.constant 1.000000e+00 : f32
    %133 = vector.broadcast %cst_40 : f32 to vector<8x128xf32>
    %134 = arith.subf %132, %133 : vector<8x128xf32>
    %135 = arith.mulf %128, %134 : vector<8x128xf32>
    %136 = arith.mulf %129, %116 : vector<8x128xf32>
    %137 = arith.addf %135, %136 : vector<8x128xf32>
    %c64_i32_41 = arith.constant 64 : i32
    %138 = tpu.dynamic_rotate %129 by %c64_i32_41 dim 1 : vector<8x128xf32>, i32 -> vector<8x128xf32>
    %139 = math.tanh %137 : vector<8x128xf32>
    %140 = arith.mulf %138, %139 : vector<8x128xf32>
    %141 = vector.extract_strided_slice %8 {offsets = [48, 0], sizes = [8, 256], strides = [1, 1]} : vector<72x256xf32> to vector<8x256xf32>
    %cst_42 = arith.constant dense<0.000000e+00> : vector<8x256xf32>
    %142 = tpu.matmul %140, %1, %cst_42 {dimension_numbers = #tpu.dot_dimension_numbers<[1], [0], [0], [1], [0, 0, 1, 1], [], []>} : vector<8x128xf32>, vector<128x256xf32>, vector<8x256xf32> -> vector<8x256xf32>
    %143 = arith.addf %141, %142 : vector<8x256xf32>
    %144 = arith.negf %143 : vector<8x256xf32>
    %145 = math.exp %144 : vector<8x256xf32>
    %cst_43 = arith.constant 1.000000e+00 : f32
    %146 = vector.broadcast %cst_43 : f32 to vector<8x256xf32>
    %147 = arith.addf %146, %145 : vector<8x256xf32>
    %148 = arith.divf %146, %147 : vector<8x256xf32>
    %149 = vector.extract_strided_slice %148 {offsets = [0, 0], sizes = [8, 128], strides = [1, 1]} : vector<8x256xf32> to vector<8x128xf32>
    %150 = vector.extract_strided_slice %148 {offsets = [0, 128], sizes = [8, 128], strides = [1, 1]} : vector<8x256xf32> to vector<8x128xf32>
    %c64_i32_44 = arith.constant 64 : i32
    %151 = tpu.dynamic_rotate %149 by %c64_i32_44 dim 1 : vector<8x128xf32>, i32 -> vector<8x128xf32>
    %cst_45 = arith.constant 2.000000e+00 : f32
    %152 = vector.broadcast %cst_45 : f32 to vector<8x128xf32>
    %153 = arith.mulf %152, %151 : vector<8x128xf32>
    %cst_46 = arith.constant 1.000000e+00 : f32
    %154 = vector.broadcast %cst_46 : f32 to vector<8x128xf32>
    %155 = arith.subf %153, %154 : vector<8x128xf32>
    %156 = arith.mulf %149, %155 : vector<8x128xf32>
    %157 = arith.mulf %150, %137 : vector<8x128xf32>
    %158 = arith.addf %156, %157 : vector<8x128xf32>
    %c64_i32_47 = arith.constant 64 : i32
    %159 = tpu.dynamic_rotate %150 by %c64_i32_47 dim 1 : vector<8x128xf32>, i32 -> vector<8x128xf32>
    %160 = math.tanh %158 : vector<8x128xf32>
    %161 = arith.mulf %159, %160 : vector<8x128xf32>
    %162 = vector.extract_strided_slice %8 {offsets = [56, 0], sizes = [8, 256], strides = [1, 1]} : vector<72x256xf32> to vector<8x256xf32>
    %cst_48 = arith.constant dense<0.000000e+00> : vector<8x256xf32>
    %163 = tpu.matmul %161, %1, %cst_48 {dimension_numbers = #tpu.dot_dimension_numbers<[1], [0], [0], [1], [0, 0, 1, 1], [], []>} : vector<8x128xf32>, vector<128x256xf32>, vector<8x256xf32> -> vector<8x256xf32>
    %164 = arith.addf %162, %163 : vector<8x256xf32>
    %165 = arith.negf %164 : vector<8x256xf32>
    %166 = math.exp %165 : vector<8x256xf32>
    %cst_49 = arith.constant 1.000000e+00 : f32
    %167 = vector.broadcast %cst_49 : f32 to vector<8x256xf32>
    %168 = arith.addf %167, %166 : vector<8x256xf32>
    %169 = arith.divf %167, %168 : vector<8x256xf32>
    %170 = vector.extract_strided_slice %169 {offsets = [0, 0], sizes = [8, 128], strides = [1, 1]} : vector<8x256xf32> to vector<8x128xf32>
    %171 = vector.extract_strided_slice %169 {offsets = [0, 128], sizes = [8, 128], strides = [1, 1]} : vector<8x256xf32> to vector<8x128xf32>
    %c64_i32_50 = arith.constant 64 : i32
    %172 = tpu.dynamic_rotate %170 by %c64_i32_50 dim 1 : vector<8x128xf32>, i32 -> vector<8x128xf32>
    %cst_51 = arith.constant 2.000000e+00 : f32
    %173 = vector.broadcast %cst_51 : f32 to vector<8x128xf32>
    %174 = arith.mulf %173, %172 : vector<8x128xf32>
    %cst_52 = arith.constant 1.000000e+00 : f32
    %175 = vector.broadcast %cst_52 : f32 to vector<8x128xf32>
    %176 = arith.subf %174, %175 : vector<8x128xf32>
    %177 = arith.mulf %170, %176 : vector<8x128xf32>
    %178 = arith.mulf %171, %158 : vector<8x128xf32>
    %179 = arith.addf %177, %178 : vector<8x128xf32>
    %c64_i32_53 = arith.constant 64 : i32
    %180 = tpu.dynamic_rotate %171 by %c64_i32_53 dim 1 : vector<8x128xf32>, i32 -> vector<8x128xf32>
    %181 = math.tanh %179 : vector<8x128xf32>
    %182 = arith.mulf %180, %181 : vector<8x128xf32>
    %183 = vector.extract_strided_slice %8 {offsets = [64, 0], sizes = [8, 256], strides = [1, 1]} : vector<72x256xf32> to vector<8x256xf32>
    %cst_54 = arith.constant dense<0.000000e+00> : vector<8x256xf32>
    %184 = tpu.matmul %182, %1, %cst_54 {dimension_numbers = #tpu.dot_dimension_numbers<[1], [0], [0], [1], [0, 0, 1, 1], [], []>} : vector<8x128xf32>, vector<128x256xf32>, vector<8x256xf32> -> vector<8x256xf32>
    %185 = arith.addf %183, %184 : vector<8x256xf32>
    %186 = arith.negf %185 : vector<8x256xf32>
    %187 = math.exp %186 : vector<8x256xf32>
    %cst_55 = arith.constant 1.000000e+00 : f32
    %188 = vector.broadcast %cst_55 : f32 to vector<8x256xf32>
    %189 = arith.addf %188, %187 : vector<8x256xf32>
    %190 = arith.divf %188, %189 : vector<8x256xf32>
    %191 = vector.extract_strided_slice %190 {offsets = [0, 0], sizes = [8, 128], strides = [1, 1]} : vector<8x256xf32> to vector<8x128xf32>
    %192 = vector.extract_strided_slice %190 {offsets = [0, 128], sizes = [8, 128], strides = [1, 1]} : vector<8x256xf32> to vector<8x128xf32>
    %c64_i32_56 = arith.constant 64 : i32
    %193 = tpu.dynamic_rotate %191 by %c64_i32_56 dim 1 : vector<8x128xf32>, i32 -> vector<8x128xf32>
    %cst_57 = arith.constant 2.000000e+00 : f32
    %194 = vector.broadcast %cst_57 : f32 to vector<8x128xf32>
    %195 = arith.mulf %194, %193 : vector<8x128xf32>
    %cst_58 = arith.constant 1.000000e+00 : f32
    %196 = vector.broadcast %cst_58 : f32 to vector<8x128xf32>
    %197 = arith.subf %195, %196 : vector<8x128xf32>
    %198 = arith.mulf %191, %197 : vector<8x128xf32>
    %199 = arith.mulf %192, %179 : vector<8x128xf32>
    %200 = arith.addf %198, %199 : vector<8x128xf32>
    %c64_i32_59 = arith.constant 64 : i32
    %201 = tpu.dynamic_rotate %192 by %c64_i32_59 dim 1 : vector<8x128xf32>, i32 -> vector<8x128xf32>
    %202 = math.tanh %200 : vector<8x128xf32>
    %203 = arith.mulf %201, %202 : vector<8x128xf32>
    %cst_60 = arith.constant 0.000000e+00 : f32
    %204 = vector.broadcast %cst_60 : f32 to vector<8x128xf32>
    %205 = arith.maximumf %203, %204 : vector<8x128xf32>
    %cst_61 = arith.constant dense<0.000000e+00> : vector<8x128xf32>
    %206 = tpu.matmul %205, %3, %cst_61 {dimension_numbers = #tpu.dot_dimension_numbers<[1], [0], [0], [1], [0, 0, 1, 1], [], []>} : vector<8x128xf32>, vector<128x128xf32>, vector<8x128xf32> -> vector<8x128xf32>
    %207 = vector.broadcast %4 : vector<1x128xf32> to vector<8x128xf32>
    %208 = arith.addf %206, %207 : vector<8x128xf32>
    %c0_62 = arith.constant 0 : index
    %c0_63 = arith.constant 0 : index
    %209 = vector.load %arg2[%c0_62, %c0_63] : memref<8x128xf32, #tpu.memory_space<vmem>>, vector<8x128xf32>
    tpu.vector_store %arg2[%c0_62, %c0_63], %208 {strides = array<i32>} : memref<8x128xf32, #tpu.memory_space<vmem>>, vector<8x128xf32>,
    return
  }
}

</mosaic_0001>

<bundles_post_ra>
// kernel: regression_lstm_forward.1
= control target key start
LH: loop header
LB: loop body
LE: loop exit
PB: predicated region body
PF: predicated region fallthrough
CT: control target
= control target key end

     0   :  { %7 = vsyncpa [#allocation3], 0  ;;  %s1642_s9 = smov [#allocation2]   ;;  %s1970_s0 = inlined_call_operand.vmem [shape: f32[72,8], index: 0, kind: input, shape index: {}]   ;;  %s1971_s1 = inlined_call_operand.hbm [shape: f32[272,256], index: 1, kind: input, shape index: {}]   ;;  %s1972_s2 = inlined_call_operand.vmem [shape: f32[8,128], index: 2, kind: output, shape index: {}]  }
   0x1   :  { %s15_s10 = sshll.u32 %s1642_s9, 4  ;;  %s1618_s13 = scalar_lea.hbm %s1971_s1, 8704  ;;  %s16_s10 = int_to_ptr.vmem [resolvable:$true] %s15_s10 }
   0x2   :  { %p1619_p0 = scmp.ne.s32.totalorder %s1971_s1, %s1618_s13  ;;  %p1622_p1 = scmp.lt.u32.totalorder %s1618_s13, %s1971_s1 }
   0x4   :  { %p1624_p2 = pnand %p1622_p1, %p1619_p0 }
   0x6   :  { %1627 = shalt.err (!%p1624_p2)
}
   0x7   :  { %s1628_s18 = scalar_lea.vmem %s16_s10, 8704  ;;  %p1633_p4 = scmp.lt.s32.totalorder %s16_s10, %s16_s10 }
   0x8   :  { %p1629_p3 = scmp.ne.s32.totalorder %s16_s10, %s1628_s18  ;;  %p1634_p5 = scmp.lt.s32.totalorder %s1628_s18, %s1628_s18 }
   0xa   :  { %p1635_p6 = por %p1634_p5, %p1633_p4 }
   0xc   :  { %p1636_p7 = pnand %p1635_p6, %p1629_p3 }
   0xe   :  { %1639 = shalt.err (!%p1636_p7)
}
   0xf   :  { %s1643_s19 = smov 256   ;;  %s1644_s20 = smov 16  }
  0x10   :  { %21 = dma.hbm_to_vmem [thread:$0]  %s1971_s1, 8704, %s16_s10, [#allocation3], %s1643_s19, %s1643_s19, %s1644_s20  }
  0x11   :  { %1640 = dma.done.wait [#allocation3], 8704  }
  0x12   :  { %1641 = vsyncadd [#allocation3], 4294958592  ;;  %v1645_v0 = vmov 0.0   ;;  %v26_v1 = vld [vmem:[#allocation2 + $0x8] sm:$0xff]  ;;  %v25_v2 = vld [vmem:[#allocation2] sm:$0xff]  ;;  %vm98_vm0 = vcmask 64512   ;;  %v88_v25 = vlaneseq }
  0x13   :  { %190 = vmatprep.mubr.f32.mxu1 %v1645_v0  ;;  %627 = vmatprep.mubr.f32.mxu0 %v1645_v0  ;;  %v78_v3 = vld [vmem:[%s1970_s0] sm:$0xff]  ;;  %v28_v4 = vld [vmem:[#allocation2 + $0x18] sm:$0xff]  ;;  %v30_v5 = vld [vmem:[#allocation2 + $0x28] sm:$0xff]  ;;  %s1646_s8 = smov 64   ;;  %vm1648_vm2 = vmmov 0  }
  0x14   :  { %126 = vmatprep.subr.mxu1 %v26_v1  ;;  %v27_v6 = vld [vmem:[#allocation2 + $0x10] sm:$0xff]  ;;  %v1683_v7 = vpack.c.bf16 %v30_v5, %v28_v4  ;;  %v29_v8 = vld [vmem:[#allocation2 + $0x20] sm:$0xff]  ;;  %v79_v9 = vld [vmem:[%s1970_s0 + $0x8] sm:$0xff]  ;;  %v89_v26 = vshrl.u32 %v88_v25, 7 }
  0x15   :  { %127 = vmatpush1.msra.mxu1 %v25_v2  ;;  %v32_v10 = vld [vmem:[#allocation2 + $0x38] sm:$0xff]  ;;  %v1688_v11 = vpack.c.bf16 %v29_v8, %v27_v6  ;;  %v34_v12 = vld [vmem:[#allocation2 + $0x48] sm:$0xff]  ;;  %v31_v13 = vld [vmem:[#allocation2 + $0x30] sm:$0xff] }
  0x16   :  { %1120 = vmatmul.mubr.msk.f32.vlgmr.msra.gmra.mrb[0].mxu1 %vm98_vm0, %v78_v3  ;;  %v33_v14 = vld [vmem:[#allocation2 + $0x40] sm:$0xff]  ;;  %1210 = vmatprep.subr.bf16.mxu1 %v1683_v7  ;;  %v1692_v15 = vpack.c.bf16 %v34_v12, %v32_v10  ;;  %v80_v16 = vld [vmem:[%s1970_s0 + $0x10] sm:$0xff]  ;;  %v36_v17 = vld [vmem:[#allocation2 + $0x58] sm:$0xff]  ;;  %v90_v27 = vsub.s32 0, %v89_v26  ;;  %v94_v29 = vsub.s32 1, %v89_v26 }
  0x17   :  { %196 = vmatprep.mubr.f32.mxu1 %v1645_v0  ;;  %v38_v18 = vld [vmem:[#allocation2 + $0x68] sm:$0xff]  ;;  %1212 = vmatpush1.bf16.msra.mxu1 %v1688_v11  ;;  %v1699_v19 = vpack.c.bf16 %v33_v14, %v31_v13  ;;  %v35_v21 = vld [vmem:[#allocation2 + $0x50] sm:$0xff]  ;;  %v37_v22 = vld [vmem:[#allocation2 + $0x60] sm:$0xff] }
  0x18   :  { %1306 = vmatprep.subr.bf16.mxu0 %v1683_v7  ;;  %1214 = vmatprep.subr.bf16.mxu1 %v1692_v15  ;;  %v1703_v20 = vpack.c.bf16 %v38_v18, %v36_v17  ;;  %v81_v23 = vld [vmem:[%s1970_s0 + $0x18] sm:$0xff]  ;;  %v1713_v24 = vpack.c.bf16 %v37_v22, %v35_v21  ;;  %v42_v42 = vld [vmem:[#allocation2 + $0x88] sm:$0xff]  ;;  %v39_v44 = vld [vmem:[#allocation2 + $0x70] sm:$0xff]  ;;  %v246_v21 = vand.u32 127, %v88_v25 }
  0x19   :  { %1308 = vmatpush1.bf16.msra.mxu0 %v1688_v11  ;;  %v60_v28 = vld [vmem:[#allocation2 + $0x110] ss:$8 sm:$0x3]  ;;  %v41_v45 = vld [vmem:[#allocation2 + $0x80] sm:$0xff]  ;;  %v46_v50 = vld [vmem:[#allocation2 + $0xa8] sm:$0xff] }
  0x1a   :  { %1121 = vmatmul.mubr.msk.f32.gmra.mrb[2].mxu1 %vm98_vm0, %v79_v9  ;;  %1310 = vmatprep.subr.bf16.mxu0 %v1692_v15  ;;  %v1723_v30 = vrot.slane %v60_v28, %v90_v27  ;;  %v1725_v31 = vrot.slane %v60_v28, %v94_v29  ;;  %v40_v41 = vld [vmem:[#allocation2 + $0x78] sm:$0xff]  ;;  %v82_v46 = vld [vmem:[%s1970_s0 + $0x20] sm:$0xff]  ;;  %v1734_v48 = vpack.c.bf16 %v41_v45, %v39_v44  ;;  %v43_v52 = vld [vmem:[#allocation2 + $0x90] sm:$0xff]  ;;  %vm247_vm1 = vcmp.lt.s32.totalorder %v246_v21, 32 }
  0x1b   :  { %202 = vmatprep.mubr.f32.mxu1 %v1645_v0  ;;  %1216 = vmatpush1.bf16.msra.mxu1 %v1699_v19  ;;  %v1729_v43 = vpack.c.bf16 %v42_v42, %v40_v41  ;;  %v44_v49 = vld [vmem:[#allocation2 + $0x98] sm:$0xff]  ;;  %v45_v53 = vld [vmem:[#allocation2 + $0xa0] sm:$0xff]  ;;  %v83_v54 = vld [vmem:[%s1970_s0 + $0x28] sm:$0xff]  ;;  %v1129_v29 = vsel %vm247_vm1, 1.0, %v1645_v0 }
  0x1c   :  { %1218 = vmatprep.subr.bf16.mxu1 %v1703_v20  ;;  %v1741_v51 = vpack.c.bf16 %v46_v50, %v44_v49  ;;  %v1747_v55 = vpack.c.bf16 %v45_v53, %v43_v52  ;;  %v48_v56 = vld [vmem:[#allocation2 + $0xb8] sm:$0xff]  ;;  %v50_v57 = vld [vmem:[#allocation2 + $0xc8] sm:$0xff]  ;;  %v84_v59 = vld [vmem:[%s1970_s0 + $0x30] sm:$0xff] }
  0x1d   :  { %1312 = vmatpush1.bf16.msra.mxu0 %v1699_v19  ;;  %v1754_v58 = vpack.c.bf16 %v50_v57, %v48_v56  ;;  %v47_v60 = vld [vmem:[#allocation2 + $0xb0] sm:$0xff]  ;;  %v49_v61 = vld [vmem:[#allocation2 + $0xc0] sm:$0xff]  ;;  %v52_v1 = vld [vmem:[#allocation2 + $0xd8] sm:$0xff] }
  0x1e   :  { %1122 = vmatmul.mubr.msk.f32.gmra.mrb[4].mxu1 %vm98_vm0, %v80_v16  ;;  %1314 = vmatprep.subr.bf16.mxu0 %v1703_v20  ;;  %v1761_v62 = vpack.c.bf16 %v49_v61, %v47_v60  ;;  %v54_v2 = vld [vmem:[#allocation2 + $0xe8] sm:$0xff]  ;;  %v85_v4 = vld [vmem:[%s1970_s0 + $0x38] sm:$0xff]  ;;  %v51_v5 = vld [vmem:[#allocation2 + $0xd0] sm:$0xff] }
  0x1f   :  { %208 = vmatprep.mubr.f32.mxu1 %v1645_v0  ;;  %1220 = vmatpush1.bf16.msra.mxu1 %v1713_v24  ;;  %v1768_v3 = vpack.c.bf16 %v54_v2, %v52_v1  ;;  %v53_v6 = vld [vmem:[#allocation2 + $0xe0] sm:$0xff]  ;;  %v56_v10 = vld [vmem:[#allocation2 + $0xf8] sm:$0xff]  ;;  %v58_v12 = vld [vmem:[#allocation2 + $0x108] sm:$0xff] }
  0x20   :  { %1222 = vmatprep.subr.bf16.mxu1 %v1729_v43  ;;  %v1775_v8 = vpack.c.bf16 %v53_v6, %v51_v5  ;;  %v86_v13 = vld [vmem:[%s1970_s0 + $0x40] sm:$0xff]  ;;  %v1785_v14 = vpack.c.bf16 %v58_v12, %v56_v10  ;;  %v55_v16 = vld [vmem:[#allocation2 + $0xf0] sm:$0xff] }
  0x21   :  { %1316 = vmatpush1.bf16.msra.mxu0 %v1713_v24  ;;  %v57_v17 = vld [vmem:[#allocation2 + $0x100] sm:$0xff] }
  0x22   :  { %1123 = vmatmul.mubr.msk.f32.gmra.mrb[6].mxu1 %vm98_vm0, %v81_v23  ;;  %1318 = vmatprep.subr.bf16.mxu0 %v1729_v43  ;;  %v1789_v18 = vpack.c.bf16 %v57_v17, %v55_v16 }
  0x23   :  { %214 = vmatprep.mubr.f32.mxu1 %v1645_v0  ;;  %1224 = vmatpush1.bf16.msra.mxu1 %v1734_v48 }
  0x24   :  { %1226 = vmatprep.subr.bf16.mxu1 %v1741_v51 }
  0x25   :  { %1320 = vmatpush1.bf16.msra.mxu0 %v1734_v48 }
  0x26   :  { %1124 = vmatmul.mubr.msk.f32.gmra.mrb[8].mxu1 %vm98_vm0, %v82_v46  ;;  %1322 = vmatprep.subr.bf16.mxu0 %v1741_v51 }
  0x27   :  { %220 = vmatprep.mubr.f32.mxu1 %v1645_v0  ;;  %1228 = vmatpush1.bf16.msra.mxu1 %v1747_v55 }
  0x28   :  { %1230 = vmatprep.subr.bf16.mxu1 %v1754_v58 }
  0x29   :  { %1324 = vmatpush1.bf16.msra.mxu0 %v1747_v55 }
  0x2a   :  { %1125 = vmatmul.mubr.msk.f32.gmra.mrb[10].mxu1 %vm98_vm0, %v83_v54  ;;  %1326 = vmatprep.subr.bf16.mxu0 %v1754_v58 }
  0x2b   :  { %226 = vmatprep.mubr.f32.mxu1 %v1645_v0  ;;  %1232 = vmatpush1.bf16.msra.mxu1 %v1761_v62 }
  0x2c   :  { %1234 = vmatprep.subr.bf16.mxu1 %v1768_v3 }
  0x2d   :  { %1328 = vmatpush1.bf16.msra.mxu0 %v1761_v62 }
  0x2e   :  { %1126 = vmatmul.mubr.msk.f32.gmra.mrb[12].mxu1 %vm98_vm0, %v84_v59  ;;  %1330 = vmatprep.subr.bf16.mxu0 %v1768_v3 }
  0x2f   :  { %232 = vmatprep.mubr.f32.mxu1 %v1645_v0  ;;  %1236 = vmatpush1.bf16.msra.mxu1 %v1775_v8 }
  0x30   :  { %1238 = vmatprep.subr.bf16.mxu1 %v1785_v14 }
  0x31   :  { %1332 = vmatpush1.bf16.msra.mxu0 %v1775_v8 }
  0x32   :  { %1127 = vmatmul.mubr.msk.f32.gmra.mrb[14].mxu1 %vm98_vm0, %v85_v4  ;;  %1334 = vmatprep.subr.bf16.mxu0 %v1785_v14 }
  0x33   :  { %238 = vmatprep.mubr.f32.mxu1 %v1645_v0  ;;  %1240 = vmatpush1.bf16.msra.mxu1 %v1789_v18 }
  0x34   :  { %1242 = vmatprep.subr.bf16.mxu1 %v1683_v7 }
  0x35   :  { %1336 = vmatpush1.bf16.msra.mxu0 %v1789_v18 }
  0x36   :  { %1128 = vmatmul.mubr.msk.f32.gmra.mrb[16].mxu1 %vm98_vm0, %v86_v13  ;;  %1338 = vmatprep.subr.bf16.mxu0 %v1683_v7 }
  0x37   :  { %339 = vmatprep.mubr.f32.mxu1 %v1645_v0 }
  0xe9   :  { %v192_v32 = vpop.f32.mrb[0].mxu1 }
  0xea   :  { %v193_v33 = vadd.f32 %v192_v32, %v1723_v30  ;;  %v194_v34 = vpop.f32.mrb[1].mxu1 }
  0xeb   :  { %v195_v35 = vadd.f32 %v194_v34, %v1725_v31 }
  0xec   :  { %v1130_v36 = vmul.f32 -1.442695, %v193_v33 }
  0xed   :  { %v1131_v37 = vmul.f32 -1.442695, %v195_v35 }
  0xee   :  { %1528 = vpow2.f32 %v1130_v36 }
  0xef   :  { %1530 = vpow2.f32 %v1131_v37 }
  0xf8   :  { %v1529_v38 = vpop.eup %1528 }
  0xf9   :  { %v1531_v39 = vpop.eup %1530  ;;  %v256_v40 = vadd.f32 1.0, %v1529_v38  ;;  %v1817_v25 = vpop.f32.mrb[8].mxu1 }
  0xfa   :  { %v257_v47 = vadd.f32 1.0, %v1531_v39  ;;  %v1819_v38 = vpop.f32.mrb[9].mxu1 }
  0xfb   :  { %1532 = vrcp.f32 %v256_v40 }
  0xfc   :  { %1534 = vrcp.f32 %v257_v47 }
  0xfd   :  { %v1821_v39 = vpop.f32.mrb[10].mxu1 }
  0xfe   :  { %v1823_v40 = vpop.f32.mrb[11].mxu1 }
 0x101   :  { %v1825_v41 = vpop.f32.mrb[12].mxu1 }
 0x102   :  { %v1827_v42 = vpop.f32.mrb[13].mxu1 }
 0x105   :  { %v1533_v63 = vpop.eup %1532  ;;  %v1829_v44 = vpop.f32.mrb[14].mxu1 }
 0x106   :  { %262 = vrot.lane.b32.xlu0 %v1533_v63, %s1646_s8  ;;  %v1535_v9 = vpop.eup %1534  ;;  %v1831_v45 = vpop.f32.mrb[15].mxu1 }
 0x107   :  { %v267_v27 = vmul.f32 0.0, %v1535_v9 }
 0x109   :  { %v1833_v46 = vpop.f32.mrb[16].mxu1 }
 0x10a   :  { %269 = vrot.lane.b32.xlu0 %v1535_v9, %s1646_s8  ;;  %v1835_v47 = vpop.f32.mrb[17].mxu1 }
 0x178   :  { %v263_v22 = vpop.permute.xlu0 %262 }
 0x179   :  { %v264_v23 = vmul.f32 2.0, %v263_v22 }
 0x17b   :  { %v1132_v26 = vadd.f32 -1.0, %v264_v23 }
 0x17c   :  { %v270_v35 = vpop.permute.xlu0 %269 }
 0x17d   :  { %v266_v28 = vmul.f32 %v1533_v63, %v1132_v26 }
 0x17f   :  { %v268_v32 = vadd.f32 %v267_v27, %v266_v28 }
 0x181   :  { %1536 = vtanh.f32 %v268_v32  ;;  %v273_v33 = vmul.f32 %v1129_v29, %v268_v32 }
 0x18b   :  { %v1537_v34 = vpop.eup %1536 }
 0x18c   :  { %v272_v36 = vmul.f32 %v1537_v34, %v270_v35 }
 0x18e   :  { %v274_v37 = vmul.f32 %v1129_v29, %v272_v36 }
 0x190   :  { %340 = vmatmul.mubr.f32.vlgmr.msra.gmra.mrb[2].mxu1 %v274_v37 }
 0x191   :  { %1244 = vmatpush1.bf16.msra.mxu1 %v1688_v11  ;;  %435 = vmatprep.mubr.f32.mxu1 %v1645_v0 }
 0x192   :  { %1246 = vmatprep.subr.bf16.mxu1 %v1692_v15 }
 0x195   :  { %1248 = vmatpush1.bf16.msra.mxu1 %v1699_v19 }
 0x196   :  { %1250 = vmatprep.subr.bf16.mxu1 %v1703_v20 }
 0x199   :  { %1252 = vmatpush1.bf16.msra.mxu1 %v1713_v24 }
 0x19a   :  { %1254 = vmatprep.subr.bf16.mxu1 %v1729_v43 }
 0x19d   :  { %1256 = vmatpush1.bf16.msra.mxu1 %v1734_v48 }
 0x19e   :  { %1258 = vmatprep.subr.bf16.mxu1 %v1741_v51 }
 0x1a1   :  { %1260 = vmatpush1.bf16.msra.mxu1 %v1747_v55 }
 0x1a2   :  { %1262 = vmatprep.subr.bf16.mxu1 %v1754_v58 }
 0x1a5   :  { %1264 = vmatpush1.bf16.msra.mxu1 %v1761_v62 }
 0x1a6   :  { %1266 = vmatprep.subr.bf16.mxu1 %v1768_v3 }
 0x1a9   :  { %1268 = vmatpush1.bf16.msra.mxu1 %v1775_v8 }
 0x1aa   :  { %1270 = vmatprep.subr.bf16.mxu1 %v1785_v14 }
 0x1ad   :  { %1272 = vmatpush1.bf16.msra.mxu1 %v1789_v18 }
 0x1ae   :  { %1274 = vmatprep.subr.bf16.mxu1 %v1683_v7 }
 0x263   :  { %v341_v49 = vpop.f32.mrb[2].mxu1 }
 0x264   :  { %v1489_v50 = vadd.f32 %v341_v49, %v1723_v30  ;;  %v343_v52 = vpop.f32.mrb[3].mxu1 }
 0x265   :  { %v1490_v53 = vadd.f32 %v343_v52, %v1725_v31 }
 0x266   :  { %v1133_v54 = vmul.f32 -1.442695, %v1489_v50 }
 0x267   :  { %v1134_v56 = vmul.f32 -1.442695, %v1490_v53 }
 0x268   :  { %1538 = vpow2.f32 %v1133_v54 }
 0x269   :  { %1540 = vpow2.f32 %v1134_v56 }
 0x272   :  { %v1539_v57 = vpop.eup %1538 }
 0x273   :  { %v1541_v59 = vpop.eup %1540  ;;  %v354_v60 = vadd.f32 1.0, %v1539_v57 }
 0x274   :  { %v355_v61 = vadd.f32 1.0, %v1541_v59 }
 0x275   :  { %1542 = vrcp.f32 %v354_v60 }
 0x276   :  { %1544 = vrcp.f32 %v355_v61 }
 0x27f   :  { %v1543_v63 = vpop.eup %1542 }
 0x280   :  { %v1545_v1 = vpop.eup %1544  ;;  %360 = vrot.lane.b32.xlu1 %v1543_v63, %s1646_s8 }
 0x281   :  { %v365_v2 = vmul.f32 %v1545_v1, %v273_v33 }
 0x284   :  { %367 = vrot.lane.b32.xlu1 %v1545_v1, %s1646_s8 }
 0x2f2   :  { %v361_v4 = vpop.permute.xlu1 %360 }
 0x2f3   :  { %v362_v5 = vmul.f32 2.0, %v361_v4 }
 0x2f5   :  { %v1135_v6 = vadd.f32 -1.0, %v362_v5 }
 0x2f6   :  { %v368_v13 = vpop.permute.xlu1 %367 }
 0x2f7   :  { %v364_v9 = vmul.f32 %v1543_v63, %v1135_v6 }
 0x2f9   :  { %v366_v10 = vadd.f32 %v365_v2, %v364_v9 }
 0x2fb   :  { %1546 = vtanh.f32 %v366_v10 }
 0x305   :  { %v1547_v12 = vpop.eup %1546 }
 0x306   :  { %v370_v16 = vmul.f32 %v1547_v12, %v368_v13 }
 0x308   :  { %436 = vmatmul.mubr.f32.vlgmr.msra.gmra.mrb[4].mxu1 %v370_v16 }
 0x309   :  { %1276 = vmatpush1.bf16.msra.mxu1 %v1688_v11  ;;  %531 = vmatprep.mubr.f32.mxu1 %v1645_v0 }
 0x30a   :  { %1278 = vmatprep.subr.bf16.mxu1 %v1692_v15 }
 0x30d   :  { %1280 = vmatpush1.bf16.msra.mxu1 %v1699_v19 }
 0x30e   :  { %1282 = vmatprep.subr.bf16.mxu1 %v1703_v20 }
 0x311   :  { %1284 = vmatpush1.bf16.msra.mxu1 %v1713_v24 }
 0x312   :  { %1286 = vmatprep.subr.bf16.mxu1 %v1729_v43 }
 0x315   :  { %1288 = vmatpush1.bf16.msra.mxu1 %v1734_v48 }
 0x316   :  { %1290 = vmatprep.subr.bf16.mxu1 %v1741_v51 }
 0x319   :  { %1292 = vmatpush1.bf16.msra.mxu1 %v1747_v55 }
 0x31a   :  { %1294 = vmatprep.subr.bf16.mxu1 %v1754_v58 }
 0x31d   :  { %1296 = vmatpush1.bf16.msra.mxu1 %v1761_v62 }
 0x31e   :  { %1298 = vmatprep.subr.bf16.mxu1 %v1768_v3 }
 0x321   :  { %1300 = vmatpush1.bf16.msra.mxu1 %v1775_v8 }
 0x322   :  { %1302 = vmatprep.subr.bf16.mxu1 %v1785_v14 }
 0x325   :  { %1304 = vmatpush1.bf16.msra.mxu1 %v1789_v18 }
 0x3db   :  { %v437_v17 = vpop.f32.mrb[4].mxu1 }
 0x3dc   :  { %v1491_v21 = vadd.f32 %v437_v17, %v1723_v30  ;;  %v439_v22 = vpop.f32.mrb[5].mxu1 }
 0x3dd   :  { %v1492_v23 = vadd.f32 %v439_v22, %v1725_v31 }
 0x3de   :  { %v1136_v26 = vmul.f32 -1.442695, %v1491_v21 }
 0x3df   :  { %v1137_v27 = vmul.f32 -1.442695, %v1492_v23 }
 0x3e0   :  { %1548 = vpow2.f32 %v1136_v26 }
 0x3e1   :  { %1550 = vpow2.f32 %v1137_v27 }
 0x3ea   :  { %v1549_v28 = vpop.eup %1548 }
 0x3eb   :  { %v1551_v29 = vpop.eup %1550  ;;  %v450_v32 = vadd.f32 1.0, %v1549_v28 }
 0x3ec   :  { %v451_v33 = vadd.f32 1.0, %v1551_v29  ;;  %v217_v29 = vadd.f32 %v1817_v25, %v1723_v30 }
 0x3ed   :  { %1552 = vrcp.f32 %v450_v32  ;;  %v219_v32 = vadd.f32 %v1819_v38, %v1725_v31 }
 0x3ee   :  { %1554 = vrcp.f32 %v451_v33 }
 0x3f7   :  { %v1553_v34 = vpop.eup %1552 }
 0x3f8   :  { %v1555_v35 = vpop.eup %1554  ;;  %456 = vrot.lane.b32.xlu0 %v1553_v34, %s1646_s8 }
 0x3f9   :  { %463 = vrot.lane.b32.xlu1 %v1555_v35, %s1646_s8  ;;  %v461_v52 = vmul.f32 %v1555_v35, %v366_v10 }
 0x46a   :  { %v457_v36 = vpop.permute.xlu0 %456 }
 0x46b   :  { %v458_v37 = vmul.f32 2.0, %v457_v36  ;;  %v464_v56 = vpop.permute.xlu1 %463 }
 0x46d   :  { %v1138_v49 = vadd.f32 -1.0, %v458_v37 }
 0x46f   :  { %v460_v50 = vmul.f32 %v1553_v34, %v1138_v49 }
 0x471   :  { %v462_v53 = vadd.f32 %v461_v52, %v460_v50 }
 0x473   :  { %1556 = vtanh.f32 %v462_v53 }
 0x47d   :  { %v1557_v54 = vpop.eup %1556 }
 0x47e   :  { %v466_v57 = vmul.f32 %v1557_v54, %v464_v56 }
 0x480   :  { %532 = vmatmul.mubr.f32.vlgmr.msra.gmra.mrb[6].mxu1 %v466_v57 }
 0x481   :  { %1206 = vmatprep.mubr.msk.f32.mxu1 %vm1648_vm2, %v1645_v0 }
 0x553   :  { %v533_v59 = vpop.f32.mrb[6].mxu1 }
 0x554   :  { %v1493_v60 = vadd.f32 %v533_v59, %v1723_v30  ;;  %v535_v61 = vpop.f32.mrb[7].mxu1 }
 0x555   :  { %v1494_v63 = vadd.f32 %v535_v61, %v1725_v31 }
 0x556   :  { %v1139_v1 = vmul.f32 -1.442695, %v1493_v60 }
 0x557   :  { %v1140_v2 = vmul.f32 -1.442695, %v1494_v63 }
 0x558   :  { %1558 = vpow2.f32 %v1139_v1 }
 0x559   :  { %1560 = vpow2.f32 %v1140_v2 }
 0x562   :  { %v1559_v4 = vpop.eup %1558 }
 0x563   :  { %v1561_v5 = vpop.eup %1560  ;;  %v546_v6 = vadd.f32 1.0, %v1559_v4 }
 0x564   :  { %v547_v9 = vadd.f32 1.0, %v1561_v5  ;;  %v223_v5 = vadd.f32 %v1821_v39, %v1723_v30 }
 0x565   :  { %1562 = vrcp.f32 %v546_v6  ;;  %v225_v6 = vadd.f32 %v1823_v40, %v1725_v31 }
 0x566   :  { %1564 = vrcp.f32 %v547_v9 }
 0x56f   :  { %v1563_v10 = vpop.eup %1562 }
 0x570   :  { %v1565_v12 = vpop.eup %1564  ;;  %552 = vrot.lane.b32.xlu0 %v1563_v10, %s1646_s8 }
 0x571   :  { %559 = vrot.lane.b32.xlu1 %v1565_v12, %s1646_s8  ;;  %v557_v22 = vmul.f32 %v1565_v12, %v462_v53 }
 0x5e2   :  { %v553_v13 = vpop.permute.xlu0 %552 }
 0x5e3   :  { %v554_v16 = vmul.f32 2.0, %v553_v13  ;;  %v560_v27 = vpop.permute.xlu1 %559 }
 0x5e5   :  { %v1141_v17 = vadd.f32 -1.0, %v554_v16 }
 0x5e7   :  { %v556_v21 = vmul.f32 %v1563_v10, %v1141_v17 }
 0x5e9   :  { %v558_v23 = vadd.f32 %v557_v22, %v556_v21 }
 0x5eb   :  { %1566 = vtanh.f32 %v558_v23 }
 0x5f5   :  { %v1567_v26 = vpop.eup %1566 }
 0x5f6   :  { %v562_v28 = vmul.f32 %v1567_v26, %v560_v27 }
 0x5f8   :  { %628 = vmatmul.mubr.f32.vlgmr.msra.gmra.mrb[0].mxu0 %v562_v28 }
 0x5f9   :  { %1340 = vmatpush1.bf16.msra.mxu0 %v1688_v11  ;;  %723 = vmatprep.mubr.f32.mxu0 %v1645_v0 }
 0x5fa   :  { %1342 = vmatprep.subr.bf16.mxu0 %v1692_v15 }
 0x5fd   :  { %1344 = vmatpush1.bf16.msra.mxu0 %v1699_v19 }
 0x5fe   :  { %1346 = vmatprep.subr.bf16.mxu0 %v1703_v20 }
 0x601   :  { %1348 = vmatpush1.bf16.msra.mxu0 %v1713_v24 }
 0x602   :  { %1350 = vmatprep.subr.bf16.mxu0 %v1729_v43 }
 0x605   :  { %1352 = vmatpush1.bf16.msra.mxu0 %v1734_v48 }
 0x606   :  { %1354 = vmatprep.subr.bf16.mxu0 %v1741_v51 }
 0x609   :  { %1356 = vmatpush1.bf16.msra.mxu0 %v1747_v55 }
 0x60a   :  { %1358 = vmatprep.subr.bf16.mxu0 %v1754_v58 }
 0x60d   :  { %1360 = vmatpush1.bf16.msra.mxu0 %v1761_v62 }
 0x60e   :  { %1362 = vmatprep.subr.bf16.mxu0 %v1768_v3 }
 0x611   :  { %1364 = vmatpush1.bf16.msra.mxu0 %v1775_v8 }
 0x612   :  { %1366 = vmatprep.subr.bf16.mxu0 %v1785_v14 }
 0x615   :  { %1368 = vmatpush1.bf16.msra.mxu0 %v1789_v18 }
 0x616   :  { %1370 = vmatprep.subr.bf16.mxu0 %v1683_v7 }
 0x6cb   :  { %v629_v33 = vpop.f32.mrb[0].mxu0 }
 0x6cc   :  { %v634_v34 = vadd.f32 %v629_v33, %v217_v29  ;;  %v631_v35 = vpop.f32.mrb[1].mxu0 }
 0x6cd   :  { %v635_v36 = vadd.f32 %v631_v35, %v219_v32 }
 0x6ce   :  { %v1142_v37 = vmul.f32 -1.442695, %v634_v34 }
 0x6cf   :  { %v1143_v49 = vmul.f32 -1.442695, %v635_v36 }
 0x6d0   :  { %1568 = vpow2.f32 %v1142_v37 }
 0x6d1   :  { %1570 = vpow2.f32 %v1143_v49  ;;  %v229_v49 = vadd.f32 %v1825_v41, %v1723_v30 }
 0x6da   :  { %v1569_v50 = vpop.eup %1568 }
 0x6db   :  { %v1571_v52 = vpop.eup %1570  ;;  %v642_v53 = vadd.f32 1.0, %v1569_v50  ;;  %v231_v50 = vadd.f32 %v1827_v42, %v1725_v31 }
 0x6dc   :  { %v643_v54 = vadd.f32 1.0, %v1571_v52 }
 0x6dd   :  { %1572 = vrcp.f32 %v642_v53 }
 0x6de   :  { %1574 = vrcp.f32 %v643_v54 }
 0x6e7   :  { %v1573_v56 = vpop.eup %1572 }
 0x6e8   :  { %v1575_v57 = vpop.eup %1574  ;;  %648 = vrot.lane.b32.xlu0 %v1573_v56, %s1646_s8 }
 0x6e9   :  { %655 = vrot.lane.b32.xlu1 %v1575_v57, %s1646_s8  ;;  %v653_v61 = vmul.f32 %v1575_v57, %v558_v23 }
 0x75a   :  { %v649_v25 = vpop.permute.xlu0 %648 }
 0x75b   :  { %v650_v38 = vmul.f32 2.0, %v649_v25  ;;  %v656_v2 = vpop.permute.xlu1 %655 }
 0x75d   :  { %v1144_v59 = vadd.f32 -1.0, %v650_v38 }
 0x75f   :  { %v652_v60 = vmul.f32 %v1573_v56, %v1144_v59 }
 0x761   :  { %v654_v63 = vadd.f32 %v653_v61, %v652_v60 }
 0x763   :  { %1576 = vtanh.f32 %v654_v63 }
 0x76d   :  { %v1577_v1 = vpop.eup %1576 }
 0x76e   :  { %v658_v4 = vmul.f32 %v1577_v1, %v656_v2 }
 0x770   :  { %724 = vmatmul.mubr.f32.vlgmr.msra.gmra.mrb[2].mxu0 %v658_v4 }
 0x771   :  { %1372 = vmatpush1.bf16.msra.mxu0 %v1688_v11  ;;  %819 = vmatprep.mubr.f32.mxu0 %v1645_v0 }
 0x772   :  { %1374 = vmatprep.subr.bf16.mxu0 %v1692_v15 }
 0x775   :  { %1376 = vmatpush1.bf16.msra.mxu0 %v1699_v19 }
 0x776   :  { %1378 = vmatprep.subr.bf16.mxu0 %v1703_v20 }
 0x779   :  { %1380 = vmatpush1.bf16.msra.mxu0 %v1713_v24 }
 0x77a   :  { %1382 = vmatprep.subr.bf16.mxu0 %v1729_v43 }
 0x77d   :  { %1384 = vmatpush1.bf16.msra.mxu0 %v1734_v48 }
 0x77e   :  { %1386 = vmatprep.subr.bf16.mxu0 %v1741_v51 }
 0x781   :  { %1388 = vmatpush1.bf16.msra.mxu0 %v1747_v55 }
 0x782   :  { %1390 = vmatprep.subr.bf16.mxu0 %v1754_v58 }
 0x785   :  { %1392 = vmatpush1.bf16.msra.mxu0 %v1761_v62 }
 0x786   :  { %1394 = vmatprep.subr.bf16.mxu0 %v1768_v3 }
 0x789   :  { %1396 = vmatpush1.bf16.msra.mxu0 %v1775_v8 }
 0x78a   :  { %1398 = vmatprep.subr.bf16.mxu0 %v1785_v14 }
 0x78d   :  { %1400 = vmatpush1.bf16.msra.mxu0 %v1789_v18 }
 0x78e   :  { %1402 = vmatprep.subr.bf16.mxu0 %v1683_v7 }
 0x843   :  { %v725_v9 = vpop.f32.mrb[2].mxu0 }
 0x844   :  { %v730_v10 = vadd.f32 %v725_v9, %v223_v5  ;;  %v727_v12 = vpop.f32.mrb[3].mxu0 }
 0x845   :  { %v731_v13 = vadd.f32 %v727_v12, %v225_v6 }
 0x846   :  { %v1145_v16 = vmul.f32 -1.442695, %v730_v10 }
 0x847   :  { %v1146_v17 = vmul.f32 -1.442695, %v731_v13 }
 0x848   :  { %1578 = vpow2.f32 %v1145_v16 }
 0x849   :  { %1580 = vpow2.f32 %v1146_v17 }
 0x852   :  { %v1579_v21 = vpop.eup %1578 }
 0x853   :  { %v1581_v22 = vpop.eup %1580  ;;  %v738_v23 = vadd.f32 1.0, %v1579_v21 }
 0x854   :  { %v739_v26 = vadd.f32 1.0, %v1581_v22 }
 0x855   :  { %1582 = vrcp.f32 %v738_v23  ;;  %v61_v23 = vld [vmem:[#allocation2 + $0x120] sm:$0xff] }
 0x856   :  { %1584 = vrcp.f32 %v739_v26  ;;  %v62_v26 = vld [vmem:[#allocation2 + $0x130] sm:$0xff] }
 0x85f   :  { %v1583_v27 = vpop.eup %1582 }
 0x860   :  { %v1585_v28 = vpop.eup %1584  ;;  %744 = vrot.lane.b32.xlu0 %v1583_v27, %s1646_s8 }
 0x861   :  { %751 = vrot.lane.b32.xlu1 %v1585_v28, %s1646_s8  ;;  %v749_v33 = vmul.f32 %v1585_v28, %v654_v63  ;;  %v1647_v28 = vmov 0.0|0.0  }
 0x862   :  { %1465 = vmatprep.subr.bf16.mxu1 %v1647_v28 }
 0x8d2   :  { %v745_v39 = vpop.permute.xlu0 %744 }
 0x8d3   :  { %v746_v40 = vmul.f32 2.0, %v745_v39  ;;  %v752_v36 = vpop.permute.xlu1 %751  ;;  %v1466_v39 = vpack.c.bf16 %v62_v26, %v61_v23 }
 0x8d5   :  { %v1147_v29 = vadd.f32 -1.0, %v746_v40  ;;  %v64_v40 = vld [vmem:[#allocation2 + $0x150] sm:$0xff]  ;;  %1467 = vmatpush3.bf16.msra.mxu1 %v1466_v39 }
 0x8d6   :  { %1468 = vmatprep.subr.bf16.mxu1 %v1647_v28 }
 0x8d7   :  { %v748_v32 = vmul.f32 %v1583_v27, %v1147_v29  ;;  %v63_v27 = vld [vmem:[#allocation2 + $0x140] sm:$0xff] }
 0x8d8   :  { %v1469_v29 = vpack.c.bf16 %v64_v40, %v63_v27 }
 0x8d9   :  { %v750_v34 = vadd.f32 %v749_v33, %v748_v32  ;;  %v241_v32 = vadd.f32 %v1833_v46, %v1723_v30  ;;  %v243_v33 = vadd.f32 %v1835_v47, %v1725_v31  ;;  %v68_v46 = vld [vmem:[#allocation2 + $0x190] sm:$0xff]  ;;  %v69_v47 = vld [vmem:[#allocation2 + $0x1a0] sm:$0xff] }
 0x8da   :  { %1470 = vmatpush3.bf16.msra.mxu1 %v1469_v29 }
 0x8db   :  { %1586 = vtanh.f32 %v750_v34  ;;  %1471 = vmatprep.subr.bf16.mxu1 %v1647_v28 }
 0x8e5   :  { %v1587_v35 = vpop.eup %1586 }
 0x8e6   :  { %v754_v37 = vmul.f32 %v1587_v35, %v752_v36 }
 0x8e8   :  { %820 = vmatmul.mubr.f32.vlgmr.msra.gmra.mrb[4].mxu0 %v754_v37 }
 0x8e9   :  { %1404 = vmatpush1.bf16.msra.mxu0 %v1688_v11  ;;  %915 = vmatprep.mubr.f32.mxu0 %v1645_v0 }
 0x8ea   :  { %1406 = vmatprep.subr.bf16.mxu0 %v1692_v15 }
 0x8ed   :  { %1408 = vmatpush1.bf16.msra.mxu0 %v1699_v19 }
 0x8ee   :  { %1410 = vmatprep.subr.bf16.mxu0 %v1703_v20 }
 0x8f1   :  { %1412 = vmatpush1.bf16.msra.mxu0 %v1713_v24 }
 0x8f2   :  { %1414 = vmatprep.subr.bf16.mxu0 %v1729_v43 }
 0x8f5   :  { %1416 = vmatpush1.bf16.msra.mxu0 %v1734_v48 }
 0x8f6   :  { %1418 = vmatprep.subr.bf16.mxu0 %v1741_v51 }
 0x8f9   :  { %1420 = vmatpush1.bf16.msra.mxu0 %v1747_v55 }
 0x8fa   :  { %1422 = vmatprep.subr.bf16.mxu0 %v1754_v58 }
 0x8fd   :  { %1424 = vmatpush1.bf16.msra.mxu0 %v1761_v62 }
 0x8fe   :  { %1426 = vmatprep.subr.bf16.mxu0 %v1768_v3 }
 0x901   :  { %1428 = vmatpush1.bf16.msra.mxu0 %v1775_v8 }
 0x902   :  { %1430 = vmatprep.subr.bf16.mxu0 %v1785_v14 }
 0x905   :  { %1432 = vmatpush1.bf16.msra.mxu0 %v1789_v18 }
 0x906   :  { %1434 = vmatprep.subr.bf16.mxu0 %v1683_v7 }
 0x9bb   :  { %v821_v52 = vpop.f32.mrb[4].mxu0 }
 0x9bc   :  { %v826_v53 = vadd.f32 %v821_v52, %v229_v49  ;;  %v823_v54 = vpop.f32.mrb[5].mxu0  ;;  %v65_v52 = vld [vmem:[#allocation2 + $0x160] sm:$0xff] }
 0x9bd   :  { %v827_v56 = vadd.f32 %v823_v54, %v231_v50 }
 0x9be   :  { %v1148_v57 = vmul.f32 -1.442695, %v826_v53  ;;  %v66_v53 = vld [vmem:[#allocation2 + $0x170] sm:$0xff] }
 0x9bf   :  { %v1149_v25 = vmul.f32 -1.442695, %v827_v56  ;;  %v1472_v54 = vpack.c.bf16 %v66_v53, %v65_v52 }
 0x9c0   :  { %1588 = vpow2.f32 %v1148_v57 }
 0x9c1   :  { %1590 = vpow2.f32 %v1149_v25  ;;  %1473 = vmatpush3.bf16.msra.mxu1 %v1472_v54 }
 0x9c2   :  { %1474 = vmatprep.subr.bf16.mxu1 %v1647_v28 }
 0x9ca   :  { %v1589_v38 = vpop.eup %1588 }
 0x9cb   :  { %v1591_v59 = vpop.eup %1590  ;;  %v834_v60 = vadd.f32 1.0, %v1589_v38 }
 0x9cc   :  { %v835_v61 = vadd.f32 1.0, %v1591_v59  ;;  %v70_v59 = vld [vmem:[#allocation2 + $0x1b0] sm:$0xff] }
 0x9cd   :  { %1592 = vrcp.f32 %v834_v60  ;;  %v1478_v60 = vpack.c.bf16 %v70_v59, %v69_v47 }
 0x9ce   :  { %1594 = vrcp.f32 %v835_v61  ;;  %v71_v61 = vld [vmem:[#allocation2 + $0x1c0] sm:$0xff] }
 0x9d7   :  { %v1593_v7 = vpop.eup %1592 }
 0x9d8   :  { %v1595_v63 = vpop.eup %1594  ;;  %840 = vrot.lane.b32.xlu0 %v1593_v7, %s1646_s8 }
 0x9d9   :  { %847 = vrot.lane.b32.xlu1 %v1595_v63, %s1646_s8  ;;  %v845_v4 = vmul.f32 %v1595_v63, %v750_v34 }
 0xa4a   :  { %v841_v41 = vpop.permute.xlu0 %840 }
 0xa4b   :  { %v842_v42 = vmul.f32 2.0, %v841_v41  ;;  %v848_v9 = vpop.permute.xlu1 %847 }
 0xa4d   :  { %v1150_v1 = vadd.f32 -1.0, %v842_v42 }
 0xa4f   :  { %v844_v2 = vmul.f32 %v1593_v7, %v1150_v1  ;;  %v72_v7 = vld [vmem:[#allocation2 + $0x1d0] sm:$0xff]  ;;  %v73_v1 = vld [vmem:[#allocation2 + $0x1e0] sm:$0xff] }
 0xa50   :  { %v1481_v63 = vpack.c.bf16 %v72_v7, %v71_v61 }
 0xa51   :  { %v846_v5 = vadd.f32 %v845_v4, %v844_v2  ;;  %v74_v2 = vld [vmem:[#allocation2 + $0x1f0] sm:$0xff] }
 0xa52   :  { %v1484_v4 = vpack.c.bf16 %v74_v2, %v73_v1 }
 0xa53   :  { %1596 = vtanh.f32 %v846_v5 }
 0xa5d   :  { %v1597_v6 = vpop.eup %1596 }
 0xa5e   :  { %v850_v10 = vmul.f32 %v1597_v6, %v848_v9  ;;  %v76_v6 = vld [vmem:[#allocation2 + $0x210] sm:$0xff] }
 0xa60   :  { %916 = vmatmul.mubr.f32.vlgmr.msra.gmra.mrb[6].mxu0 %v850_v10 }
 0xa61   :  { %1436 = vmatpush1.bf16.msra.mxu0 %v1688_v11  ;;  %1011 = vmatprep.mubr.f32.mxu0 %v1645_v0  ;;  %v235_v11 = vadd.f32 %v1829_v44, %v1723_v30  ;;  %v67_v30 = vld [vmem:[#allocation2 + $0x180] sm:$0xff] }
 0xa62   :  { %1438 = vmatprep.subr.bf16.mxu0 %v1692_v15  ;;  %v237_v15 = vadd.f32 %v1831_v45, %v1725_v31  ;;  %v1475_v31 = vpack.c.bf16 %v68_v46, %v67_v30 }
 0xa64   :  { %1476 = vmatpush3.bf16.msra.mxu1 %v1475_v31 }
 0xa65   :  { %1440 = vmatpush1.bf16.msra.mxu0 %v1699_v19  ;;  %1477 = vmatprep.subr.bf16.mxu1 %v1647_v28 }
 0xa66   :  { %1442 = vmatprep.subr.bf16.mxu0 %v1703_v20 }
 0xa68   :  { %1479 = vmatpush3.bf16.msra.mxu1 %v1478_v60 }
 0xa69   :  { %1444 = vmatpush1.bf16.msra.mxu0 %v1713_v24  ;;  %1480 = vmatprep.subr.bf16.mxu1 %v1647_v28 }
 0xa6a   :  { %1446 = vmatprep.subr.bf16.mxu0 %v1729_v43 }
 0xa6c   :  { %1482 = vmatpush3.bf16.msra.mxu1 %v1481_v63 }
 0xa6d   :  { %1448 = vmatpush1.bf16.msra.mxu0 %v1734_v48  ;;  %1483 = vmatprep.subr.bf16.mxu1 %v1647_v28 }
 0xa6e   :  { %1450 = vmatprep.subr.bf16.mxu0 %v1741_v51 }
 0xa70   :  { %1485 = vmatpush3.bf16.msra.mxu1 %v1484_v4 }
 0xa71   :  { %1452 = vmatpush1.bf16.msra.mxu0 %v1747_v55  ;;  %1486 = vmatprep.subr.bf16.mxu1 %v1647_v28 }
 0xa72   :  { %1454 = vmatprep.subr.bf16.mxu0 %v1754_v58 }
 0xa75   :  { %1456 = vmatpush1.bf16.msra.mxu0 %v1761_v62 }
 0xa76   :  { %1458 = vmatprep.subr.bf16.mxu0 %v1768_v3 }
 0xa79   :  { %1460 = vmatpush1.bf16.msra.mxu0 %v1775_v8 }
 0xa7a   :  { %1462 = vmatprep.subr.bf16.mxu0 %v1785_v14 }
 0xa7d   :  { %1464 = vmatpush1.bf16.msra.mxu0 %v1789_v18 }
 0xb33   :  { %v917_v19 = vpop.f32.mrb[6].mxu0 }
 0xb34   :  { %v922_v20 = vadd.f32 %v917_v19, %v235_v11  ;;  %v919_v24 = vpop.f32.mrb[7].mxu0 }
 0xb35   :  { %v923_v43 = vadd.f32 %v919_v24, %v237_v15 }
 0xb36   :  { %v1151_v48 = vmul.f32 -1.442695, %v922_v20 }
 0xb37   :  { %v1152_v51 = vmul.f32 -1.442695, %v923_v43 }
 0xb38   :  { %1598 = vpow2.f32 %v1151_v48 }
 0xb39   :  { %1600 = vpow2.f32 %v1152_v51 }
 0xb42   :  { %v1599_v55 = vpop.eup %1598 }
 0xb43   :  { %v1601_v58 = vpop.eup %1600  ;;  %v930_v62 = vadd.f32 1.0, %v1599_v55 }
 0xb44   :  { %v931_v3 = vadd.f32 1.0, %v1601_v58  ;;  %v77_v58 = vld [vmem:[#allocation2 + $0x111] ss:$0 sm:$0xff] }
 0xb45   :  { %1602 = vrcp.f32 %v930_v62 }
 0xb46   :  { %1604 = vrcp.f32 %v931_v3 }
 0xb4f   :  { %v1603_v8 = vpop.eup %1602 }
 0xb50   :  { %v1605_v14 = vpop.eup %1604  ;;  %936 = vrot.lane.b32.xlu0 %v1603_v8, %s1646_s8 }
 0xb51   :  { %943 = vrot.lane.b32.xlu1 %v1605_v14, %s1646_s8  ;;  %v941_v13 = vmul.f32 %v1605_v14, %v846_v5  ;;  %v75_v5 = vld [vmem:[#allocation2 + $0x200] sm:$0xff] }
 0xb52   :  { %v1487_v9 = vpack.c.bf16 %v76_v6, %v75_v5 }
 0xb54   :  { %1488 = vmatpush3.bf16.msra.mxu1 %v1487_v9 }
 0xbc2   :  { %v937_v18 = vpop.permute.xlu0 %936 }
 0xbc3   :  { %v938_v44 = vmul.f32 2.0, %v937_v18  ;;  %v944_v21 = vpop.permute.xlu1 %943 }
 0xbc5   :  { %v1153_v45 = vadd.f32 -1.0, %v938_v44 }
 0xbc7   :  { %v940_v12 = vmul.f32 %v1603_v8, %v1153_v45 }
 0xbc9   :  { %v1956_v16 = vadd.f32 %v941_v13, %v940_v12 }
 0xbcb   :  { %1606 = vtanh.f32 %v1956_v16 }
 0xbd5   :  { %v1607_v17 = vpop.eup %1606 }
 0xbd6   :  { %v946_v22 = vmul.f32 %v1607_v17, %v944_v21 }
 0xbd8   :  { %1012 = vmatmul.mubr.f32.vlgmr.msra.gmra.mrb[8].mxu0 %v946_v22 }
 0xcab   :  { %v1013_v34 = vpop.f32.mrb[8].mxu0 }
 0xcac   :  { %v1018_v35 = vadd.f32 %v1013_v34, %v241_v32  ;;  %v1015_v36 = vpop.f32.mrb[9].mxu0 }
 0xcad   :  { %v1019_v37 = vadd.f32 %v1015_v36, %v243_v33 }
 0xcae   :  { %v1154_v49 = vmul.f32 -1.442695, %v1018_v35 }
 0xcaf   :  { %v1155_v50 = vmul.f32 -1.442695, %v1019_v37 }
 0xcb0   :  { %1608 = vpow2.f32 %v1154_v49 }
 0xcb1   :  { %1610 = vpow2.f32 %v1155_v50 }
 0xcba   :  { %v1609_v56 = vpop.eup %1608 }
 0xcbb   :  { %v1611_v57 = vpop.eup %1610  ;;  %v1026_v25 = vadd.f32 1.0, %v1609_v56 }
 0xcbc   :  { %v1027_v38 = vadd.f32 1.0, %v1611_v57 }
 0xcbd   :  { %1612 = vrcp.f32 %v1026_v25 }
 0xcbe   :  { %1614 = vrcp.f32 %v1027_v38 }
 0xcc7   :  { %v1613_v41 = vpop.eup %1612 }
 0xcc8   :  { %v1615_v42 = vpop.eup %1614  ;;  %1032 = vrot.lane.b32.xlu0 %v1613_v41, %s1646_s8 }
 0xcc9   :  { %1039 = vrot.lane.b32.xlu1 %v1615_v42, %s1646_s8  ;;  %v1037_v20 = vmul.f32 %v1615_v42, %v1956_v16 }
 0xd3a   :  { %v1033_v10 = vpop.permute.xlu0 %1032 }
 0xd3b   :  { %v1034_v11 = vmul.f32 2.0, %v1033_v10  ;;  %v1040_v48 = vpop.permute.xlu1 %1039 }
 0xd3d   :  { %v1156_v15 = vadd.f32 -1.0, %v1034_v11 }
 0xd3f   :  { %v1036_v19 = vmul.f32 %v1613_v41, %v1156_v15 }
 0xd41   :  { %v1038_v24 = vadd.f32 %v1037_v20, %v1036_v19 }
 0xd43   :  { %1616 = vtanh.f32 %v1038_v24 }
 0xd4d   :  { %v1617_v43 = vpop.eup %1616 }
 0xd4e   :  { %v1042_v51 = vmul.f32 %v1617_v43, %v1040_v48 }
 0xd50   :  { %v1043_v55 = vmax.f32 %v1042_v51, 0.0 }
 0xd52   :  { %1207 = vmatmul.mubr.f32.vlgmr.msra.gmra.mrb[18].mxu1 %v1043_v55 }
 0xe25   :  { %v1110_v62 = vpop.f32.mrb[18].mxu1 }
 0xe26   :  { %v1111_v3 = vadd.f32 %v1110_v62, %v77_v58  ;;  %v1208_v8 = vpop.f32.mrb[19].mxu1 }
 0xe28   :  { %1114 = vst [vmem:[%s1972_s2] sm:$0xff] %v1111_v3 }
 0xe29   :  { %1119 = vsyncpa [#allocation3], 1 }

</bundles_post_ra>
